<compile_context>
chip_gen: v6e
topology: v6e:2x2x1
jax: 0.10.0
libtpu: 0.0.40
codegen_flags: <defaults>
</compile_context>

<pallas_src>
import jax
import jax.numpy as jnp
from jax import lax
from jax.experimental import pallas as pl
from jax.experimental.pallas import tpu as pltpu


def _round_up(n, m):
    return ((n + m - 1) // m) * m


# The streamed x tile (TILE_N, feat_dim) lane-pads feat_dim -> 128 in VMEM, so a 16K
# tile costs 8 MiB per buffer (16 MiB double-buffered) -- comfortable on every
# generation including v7x's 64 MiB physical VMEM, while each grid step still moves
# >1 MiB of HBM so the per-step overhead is well amortized.
_TILE_N_CAP = 16 * 1024


def _pick_tile_n(num_nodes):
    """Node-tile size: multiple of 128, >= 8 grid steps for large N, VMEM-capped."""
    target = _round_up(max((num_nodes + 7) // 8, 128), 128)
    tn = min(_TILE_N_CAP, target)
    if num_nodes < tn and num_nodes % 8 == 0:
        tn = num_nodes  # exact fit for small sublane-aligned batches (no masked tail)
    return tn


def _one_layer_rio_kernel(w_agg_ref, w_label_ref, weight_ref, x_ref, gnn_ref, lab_ref):
    """Fused OneLayerRio forward for one node tile.

    w_agg_ref:   (embed_dim, feat_dim)    bf16  VMEM-resident  -- inter1 stub aggregation weight
    w_label_ref: (num_classes, feat_dim)  bf16  VMEM-resident  -- inter1 stub label-score weight
    weight_ref:  (num_classes, embed_dim) bf16  VMEM-resident  -- self.weight
    x_ref:       (TILE_N, feat_dim)       f32   streamed       -- row-major node features
    gnn_ref:     (num_classes, TILE_N)    f32   lane-dense     -- self.weight @ embeds1
    lab_ref:     (num_classes, TILE_N)    f32   lane-dense     -- label_scores
    """
    x = x_ref[...].astype(jnp.bfloat16)          # cast in VMEM; HBM stream stays f32 row-major
    contract_feat = (((1,), (1,)), ((), ()))     # contract the feature axis of both operands

    # inter1 stub aggregation fused in VMEM: embeds1 = tanh(W_agg @ X^T) -> (D, TILE_N).
    e32 = lax.dot_general(w_agg_ref[...], x, contract_feat,
                          preferred_element_type=jnp.float32)
    embeds = jnp.tanh(e32.astype(jnp.bfloat16))  # bf16 tanh: EUP bf16 path on v6e/v7x

    # scores = self.weight.mm(embeds1), kept lane-dense as (C, TILE_N); native bf16 MXU,
    # f32 accumulation (the .t() happens once in the wrapper).
    gnn_ref[...] = jnp.dot(weight_ref[...], embeds, preferred_element_type=jnp.float32)

    # label_scores (stub) = W_label @ X^T, lane-dense (C, TILE_N).
    lab_ref[...] = lax.dot_general(w_label_ref[...], x, contract_feat,
                                   preferred_element_type=jnp.float32)


def one_layer_rio_forward(weight, w_agg, w_label, node_feats):
    """Full OneLayerRio.forward: (scores.t(), label_scores).

    weight:     (num_classes, embed_dim) f32   -- nn.Parameter self.weight
    w_agg:      (embed_dim, feat_dim)    f32   -- stub inter1 aggregation weight
    w_label:    (num_classes, feat_dim)  f32   -- stub inter1 label weight
    node_feats: (num_nodes, feat_dim)    f32   -- row-major node features for the batch
    """
    num_classes, embed_dim = weight.shape
    embed_dim2, feat_dim = w_agg.shape
    num_nodes, feat_dim2 = node_feats.shape
    assert embed_dim == embed_dim2 and feat_dim == feat_dim2
    assert w_label.shape == (num_classes, feat_dim)

    tn = _pick_tile_n(num_nodes)
    grid = (pl.cdiv(num_nodes, tn),)   # ragged tail handled by Pallas block masking

    gnn_t, lab_t = pl.pallas_call(
        _one_layer_rio_kernel,
        out_shape=(
            jax.ShapeDtypeStruct((num_classes, num_nodes), jnp.float32),
            jax.ShapeDtypeStruct((num_classes, num_nodes), jnp.float32),
        ),
        grid_spec=pltpu.PrefetchScalarGridSpec(
            num_scalar_prefetch=0,
            grid=grid,
            in_specs=[
                pl.BlockSpec((embed_dim, feat_dim), lambda i: (0, 0)),     # w_agg (resident)
                pl.BlockSpec((num_classes, feat_dim), lambda i: (0, 0)),   # w_label (resident)
                pl.BlockSpec((num_classes, embed_dim), lambda i: (0, 0)),  # weight (resident)
                # Streamed node features, row-major, no wrapper pre-pass.
                # TODO(synk): if an xprof trace still shows exposed input DMA at this
                # tile size, add pipeline_mode=pl.Buffered(3) to this spec only.
                pl.BlockSpec((tn, feat_dim), lambda i: (i, 0)),
            ],
            out_specs=(
                pl.BlockSpec((num_classes, tn), lambda i: (0, i)),
                pl.BlockSpec((num_classes, tn), lambda i: (0, i)),
            ),
        ),
        compiler_params=pltpu.CompilerParams(
            dimension_semantics=("parallel",),      # shard node axis across TCs on v7x
            vmem_limit_bytes=40 * 1024 * 1024,      # explicit: v5e defaults to only 16 MiB
        ),
    )(
        w_agg.astype(jnp.bfloat16),    # tiny resident weights: cast cost is negligible
        w_label.astype(jnp.bfloat16),
        weight.astype(jnp.bfloat16),
        node_feats,                    # streamed f32; cast to bf16 in-kernel
    )

    # Module layout: scores.t() and label_scores as (num_nodes, num_classes).
    return gnn_t.T, lab_t.T


def xavier_uniform(key, shape, dtype=jnp.float32):
    """Matches torch.nn.init.xavier_uniform_ for a 2-D tensor (fan_out, fan_in)."""
    fan_out, fan_in = shape
    bound = (6.0 / (fan_in + fan_out)) ** 0.5
    return jax.random.uniform(key, shape, dtype=dtype, minval=-bound, maxval=bound)


if __name__ == "__main__":
    # Small, deterministic shapes consistent with the module.
    num_classes = 2
    embed_dim = 32     # inter1.embed_dim
    feat_dim = 16
    num_nodes = 8      # batch of node indices

    key = jax.random.PRNGKey(0)
    k_w, k_agg, k_lab, k_x = jax.random.split(key, 4)

    # self.weight = nn.Parameter(FloatTensor(num_classes, embed_dim)); xavier_uniform_
    weight = xavier_uniform(k_w, (num_classes, embed_dim))

    # Stub inter1 parameters (deterministic).
    w_agg = xavier_uniform(k_agg, (embed_dim, feat_dim))
    w_label = xavier_uniform(k_lab, (num_classes, feat_dim))

    # Node features standing in for `nodes` lookups inside inter1.
    node_feats = jax.random.normal(k_x, (num_nodes, feat_dim), dtype=jnp.float32)

    gnn_scores, label_scores = one_layer_rio_forward(weight, w_agg, w_label, node_feats)
    gnn_scores = jax.block_until_ready(gnn_scores)
    label_scores = jax.block_until_ready(label_scores)

    # Reference in plain JAX, mirroring the kernel's intentional mixed precision
    # (bf16 operands, f32 MXU accumulation, bf16 tanh).
    x_bf = node_feats.astype(jnp.bfloat16)
    wa_bf = w_agg.astype(jnp.bfloat16)
    wl_bf = w_label.astype(jnp.bfloat16)
    w_bf = weight.astype(jnp.bfloat16)
    e_ref = jnp.tanh(jnp.dot(wa_bf, x_bf.T, preferred_element_type=jnp.float32)
                     .astype(jnp.bfloat16))
    gnn_ref = jnp.dot(w_bf, e_ref, preferred_element_type=jnp.float32).T
    lab_ref = jnp.dot(wl_bf, x_bf.T, preferred_element_type=jnp.float32).T

    assert gnn_scores.shape == (num_nodes, num_classes)
    assert label_scores.shape == (num_nodes, num_classes)
    # Tolerance reflects the intentional bf16 tanh / bf16 MXU path (vs PyTorch f32 mm).
    assert jnp.allclose(gnn_scores, gnn_ref, atol=5e-2, rtol=5e-2)
    assert jnp.allclose(label_scores, lab_ref, atol=5e-2, rtol=5e-2)

    print("KERNEL_OK")
</pallas_src>

<mosaic_0001>
module attributes {stable_mosaic.version = 11 : i64} {
  func.func @_one_layer_rio_kernel(%arg0: i32, %arg1: memref<32x16xbf16, #tpu.memory_space<vmem>>, %arg2: memref<2x16xbf16, #tpu.memory_space<vmem>>, %arg3: memref<2x32xbf16, #tpu.memory_space<vmem>>, %arg4: memref<8x16xf32, #tpu.memory_space<vmem>>, %arg5: memref<2x8xf32, #tpu.memory_space<vmem>>, %arg6: memref<2x8xf32, #tpu.memory_space<vmem>>) attributes {dimension_semantics = [#tpu.dimension_semantics<parallel>], iteration_bounds = array<i64: 1>, scalar_prefetch = 0 : i64, scratch_operands = 0 : i64, tpu.core_type = #tpu.core_type<tc>, window_params = [{pipeline_mode = #tpu.pipeline_mode<synchronous>, transform_indices = @transform_0, window_bounds = array<i64: 32, 16>}, {pipeline_mode = #tpu.pipeline_mode<synchronous>, transform_indices = @transform_1, window_bounds = array<i64: 2, 16>}, {pipeline_mode = #tpu.pipeline_mode<synchronous>, transform_indices = @transform_2, window_bounds = array<i64: 2, 32>}, {transform_indices = @transform_3, window_bounds = array<i64: 8, 16>}, {transform_indices = @transform_4, window_bounds = array<i64: 2, 8>}, {transform_indices = @transform_5, window_bounds = array<i64: 2, 8>}]} {
    %c0 = arith.constant 0 : index
    %c0_0 = arith.constant 0 : index
    %0 = vector.load %arg4[%c0, %c0_0] : memref<8x16xf32, #tpu.memory_space<vmem>>, vector<8x16xf32>
    %1 = arith.truncf %0 : vector<8x16xf32> to vector<8x16xbf16>
    %c0_1 = arith.constant 0 : index
    %c0_2 = arith.constant 0 : index
    %2 = vector.load %arg1[%c0_1, %c0_2] : memref<32x16xbf16, #tpu.memory_space<vmem>>, vector<32x16xbf16>
    %cst = arith.constant dense<0.000000e+00> : vector<32x8xf32>
    %3 = tpu.matmul %2, %1, %cst {dimension_numbers = #tpu.dot_dimension_numbers<[1], [1], [0], [0], [0, 0, 1, 0], [], []>} : vector<32x16xbf16>, vector<8x16xbf16>, vector<32x8xf32> -> vector<32x8xf32>
    %4 = arith.truncf %3 : vector<32x8xf32> to vector<32x8xbf16>
    %5 = math.tanh %4 : vector<32x8xbf16>
    %c0_3 = arith.constant 0 : index
    %c0_4 = arith.constant 0 : index
    %6 = vector.load %arg3[%c0_3, %c0_4] : memref<2x32xbf16, #tpu.memory_space<vmem>>, vector<2x32xbf16>
    %cst_5 = arith.constant dense<0.000000e+00> : vector<2x8xf32>
    %7 = tpu.matmul %6, %5, %cst_5 {dimension_numbers = #tpu.dot_dimension_numbers<[1], [0], [0], [1], [0, 0, 1, 1], [], []>} : vector<2x32xbf16>, vector<32x8xbf16>, vector<2x8xf32> -> vector<2x8xf32>
    %c0_6 = arith.constant 0 : index
    %c0_7 = arith.constant 0 : index
    %8 = vector.load %arg5[%c0_6, %c0_7] : memref<2x8xf32, #tpu.memory_space<vmem>>, vector<2x8xf32>
    tpu.vector_store %arg5[%c0_6, %c0_7], %7 {strides = array<i32>} : memref<2x8xf32, #tpu.memory_space<vmem>>, vector<2x8xf32>,
    %c0_8 = arith.constant 0 : index
    %c0_9 = arith.constant 0 : index
    %9 = vector.load %arg2[%c0_8, %c0_9] : memref<2x16xbf16, #tpu.memory_space<vmem>>, vector<2x16xbf16>
    %cst_10 = arith.constant dense<0.000000e+00> : vector<2x8xf32>
    %10 = tpu.matmul %9, %1, %cst_10 {dimension_numbers = #tpu.dot_dimension_numbers<[1], [1], [0], [0], [0, 0, 1, 0], [], []>} : vector<2x16xbf16>, vector<8x16xbf16>, vector<2x8xf32> -> vector<2x8xf32>
    %c0_11 = arith.constant 0 : index
    %c0_12 = arith.constant 0 : index
    %11 = vector.load %arg6[%c0_11, %c0_12] : memref<2x8xf32, #tpu.memory_space<vmem>>, vector<2x8xf32>
    tpu.vector_store %arg6[%c0_11, %c0_12], %10 {strides = array<i32>} : memref<2x8xf32, #tpu.memory_space<vmem>>, vector<2x8xf32>,
    return
  }
  func.func @transform_0(%arg0: i32) -> (i32, i32) {
    %c0_i32 = arith.constant 0 : i32
    %c0_i32_0 = arith.constant 0 : i32
    %c0_i32_1 = arith.constant 0 : i32
    return %c0_i32, %c0_i32_0 : i32, i32
  }
  func.func @transform_1(%arg0: i32) -> (i32, i32) {
    %c0_i32 = arith.constant 0 : i32
    %c0_i32_0 = arith.constant 0 : i32
    %c0_i32_1 = arith.constant 0 : i32
    return %c0_i32, %c0_i32_0 : i32, i32
  }
  func.func @transform_2(%arg0: i32) -> (i32, i32) {
    %c0_i32 = arith.constant 0 : i32
    %c0_i32_0 = arith.constant 0 : i32
    %c0_i32_1 = arith.constant 0 : i32
    return %c0_i32, %c0_i32_0 : i32, i32
  }
  func.func @transform_3(%arg0: i32) -> (i32, i32) {
    %c0_i32 = arith.constant 0 : i32
    %c0_i32_0 = arith.constant 0 : i32
    return %arg0, %c0_i32 : i32, i32
  }
  func.func @transform_4(%arg0: i32) -> (i32, i32) {
    %c0_i32 = arith.constant 0 : i32
    %c0_i32_0 = arith.constant 0 : i32
    return %c0_i32, %arg0 : i32, i32
  }
  func.func @transform_5(%arg0: i32) -> (i32, i32) {
    %c0_i32 = arith.constant 0 : i32
    %c0_i32_0 = arith.constant 0 : i32
    return %c0_i32, %arg0 : i32, i32
  }
}

</mosaic_0001>

<bundles_post_ra>
// kernel: tpu_custom_call.1
= control target key start
LH: loop header
LB: loop body
LE: loop exit
PB: predicated region body
PF: predicated region fallthrough
CT: control target
= control target key end

     0   :  { %11 = vsyncpa [#allocation3], 0  ;;  %vm38_vm0 = vcmask 130048   ;;  %s372_s0 = inlined_call_operand.vmem [shape: bf16[32,16], index: 0, kind: input, shape index: {}]   ;;  %s373_s1 = inlined_call_operand.vmem [shape: bf16[2,16], index: 1, kind: input, shape index: {}]   ;;  %s374_s2 = inlined_call_operand.vmem [shape: bf16[2,32], index: 2, kind: input, shape index: {}]   ;;  %s375_s3 = inlined_call_operand.vmem [shape: f32[8,16], index: 3, kind: input, shape index: {}]   ;;  %s376_s4 = inlined_call_operand.hbm [shape: f32[2,8], index: 4, kind: output, shape index: {0}]   ;;  %s377_s5 = inlined_call_operand.hbm [shape: f32[2,8], index: 5, kind: output, shape index: {1}]  }
   0x1   :  { %v22_v0 = vld [vmem:[%s375_s3] sm:$0xff] }
   0x2   :  { %v23_v1 = vpack.c.bf16 %v22_v0, %v22_v0  ;;  %v260_v2 = vld [vmem:[%s372_s0] sm:$0xff]  }
   0x3   :  { %12 = vsyncpa [#allocation5], 0  ;;  %237 = vmatprep.mubr.msk.bf16.mxu0 %vm38_vm0, %v260_v2  ;;  %v261_v4 = vld [vmem:[%s372_s0 + $0x8] sm:$0xff]   ;;  %v310_v5 = vmov 0.0   ;;  %vm311_vm1 = vmmov 0   ;;  %vm102_vm2 = vcmask 261120  }
   0x4   :  { %255 = vmatprep.subr.msk.bf16.mxu0 %vm38_vm0, %v23_v1  ;;  %v46_v3 = vsel %vm38_vm0, %v23_v1, 0  ;;  %241 = vmatprep.subr.bf16.mxu1 %v310_v5  ;;  %v148_v6 = vld [vmem:[%s373_s1] sm:$0x1]  ;;  %vm146_vm3 = vcmask 58368   ;;  %s312_s1 = smov [#allocation4]  }
   0x5   :  { %236 = vmatpush3.bf16.xpose.msra.mxu0 %v46_v3  ;;  %245 = vmatprep.mubr.msk.bf16.mxu1 %vm311_vm1, %v310_v5  ;;  %v101_v15 = vld [vmem:[%s374_s2] sm:$0x1]  ;;  %s209_s26 = sshll.u32 %s312_s1, 4  ;;  %s210_s26 = int_to_ptr.vmem [resolvable:$true] %s209_s26 }
   0x6   :  { %249 = vmatprep.subr.bf16.mxu0 %v310_v5  ;;  %s266_s27 = scalar_lea.vmem %s210_s26, 32  ;;  %p271_p1 = scmp.lt.s32.totalorder %s210_s26, %s210_s26 }
   0x7   :  { %p267_p0 = scmp.ne.s32.totalorder %s210_s26, %s266_s27  ;;  %p272_p2 = scmp.lt.s32.totalorder %s266_s27, %s266_s27 }
   0x9   :  { %p273_p3 = por %p272_p2, %p271_p1 }
   0xb   :  { %p274_p4 = pnand %p273_p3, %p267_p0 }
   0xc   :  { %238 = vmatmul.mubr.msk.bf16.vlgmr.msra.gmra.mxu0 %vm38_vm0, %v261_v4 }
   0xd   :  { %250 = vmatpush3.bf16.xpose.msra.mxu0 %v46_v3  ;;  %251 = vmatprep.mubr.msk.bf16.mxu0 %vm311_vm1, %v310_v5 }
  0x14   :  { %252 = vmatmul.mubr.msk.bf16.vlgmr.msra.gmra.mxu0 %vm38_vm0, %v148_v6 }
  0xcc   :  { %v239_v7 = vpop.f32.mrf.mxu0 }
  0xce   :  { %v82_v8 = vpop.f32.mrf.mxu0 }
  0xd0   :  { %v240_v9 = vpop.f32.mrf.mxu0 }
  0xd1   :  { %v98_v10 = vpack.c.bf16 %v240_v9, %v239_v7 }
  0xd2   :  { %v85_v11 = vpop.f32.mrf.mxu0 }
  0xd3   :  { %262 = vtanh.bf16 %v98_v10  ;;  %v97_v12 = vpack.c.bf16 %v85_v11, %v82_v8 }
  0xd4   :  { %v186_v16 = vpop.f32.mrf.mxu0 }
  0xd5   :  { %264 = vtanh.bf16 %v97_v12  ;;  %192 = vst.msk [vmem:[#allocation4] sm:$0x3] %vm146_vm3, %v186_v16 }
  0xd6   :  { %v253_v17 = vpop.f32.mrf.mxu0 }
  0xd8   :  { %v189_v18 = vpop.f32.mrf.mxu0 }
  0xda   :  { %v254_v19 = vpop.f32.mrf.mxu0 }
  0xe1   :  { %v263_v13 = vpop.eup %262 }
  0xe2   :  { %242 = vmatpush3.bf16.msra.mxu1 %v263_v13 }
  0xe3   :  { %243 = vmatprep.subr.bf16.mxu1 %v310_v5  ;;  %v265_v14 = vpop.eup %264 }
  0xe6   :  { %244 = vmatpush3.bf16.msra.mxu1 %v265_v14 }
  0xe9   :  { %246 = vmatmul.mubr.msk.bf16.vlgmr.msra.gmra.mxu1 %vm102_vm2, %v101_v15 }
  0xea   :  { %277 = shalt.err (!%p274_p4)
}
  0xeb   :  { %212 = dma.vmem_to_hbm [thread:$0]  %s210_s26, 32, %s377_s5, [#allocation5]  }
  0xec   :  { %s313_s29 = smov [#allocation2]  }
  0xed   :  { %s199_s30 = sshll.u32 %s313_s29, 4  ;;  %s200_s30 = int_to_ptr.vmem [resolvable:$true] %s199_s30 }
  0xee   :  { %s286_s6 = scalar_lea.vmem %s200_s30, 32  ;;  %p291_p6 = scmp.lt.s32.totalorder %s200_s30, %s200_s30 }
  0xef   :  { %p287_p5 = scmp.ne.s32.totalorder %s200_s30, %s286_s6  ;;  %p292_p7 = scmp.lt.s32.totalorder %s286_s6, %s286_s6 }
  0xf1   :  { %p293_p8 = por %p292_p7, %p291_p6 }
  0xf3   :  { %p294_p9 = pnand %p293_p8, %p287_p5 }
 0x1a9   :  { %v140_v20 = vpop.f32.mrf.mxu1 }
 0x1aa   :  { %147 = vst.msk [vmem:[#allocation2] sm:$0x3] %vm146_vm3, %v140_v20 }
 0x1ab   :  { %v247_v21 = vpop.f32.mrf.mxu1 }
 0x1ac   :  { %297 = shalt.err (!%p294_p9)
}
 0x1ad   :  { %202 = dma.vmem_to_hbm [thread:$0]  %s200_s30, 32, %s376_s4, [#allocation3]   ;;  %v143_v22 = vpop.f32.mrf.mxu1 }
 0x1af   :  { %v248_v23 = vpop.f32.mrf.mxu1 }
 0x1b0   :  { %306 = dma.done.wait [#allocation3], 32  }
 0x1b1   :  { %307 = vsyncadd [#allocation3], 4294967264 }
 0x1b2   :  { %308 = dma.done.wait [#allocation5], 32  }
 0x1b3   :  { %309 = vsyncadd [#allocation5], 4294967264 }
 0x1b4   :  { %219 = vsyncpa [#allocation3], 1 }
 0x1b5   :  { %220 = vsyncpa [#allocation5], 1 }

</bundles_post_ra>
